<compile_context>
chip_gen: v6e
topology: v6e:2x2x1
jax: 0.10.0
libtpu: 0.0.40
codegen_flags: <defaults>
</compile_context>

<pallas_src>
import functools

import jax
import jax.numpy as jnp
from jax.experimental import pallas as pl
from jax.experimental.pallas import tpu as pltpu


def _round_up(x: int, m: int) -> int:
    return ((x + m - 1) // m) * m


def _pick_hidden_chunk(dff: int) -> int:
    """Largest lane-aligned chunk of the hidden dim (keeps the f32 intermediate
    at (TM, chunk)); falls back to full dff when it is small / not 128-aligned."""
    if dff <= 512:
        return dff
    for c in (512, 384, 256, 128):
        if dff % c == 0:
            return c
    return dff


# ----------------------------------------------------------------------------
# Kernel: one row-tile of  out = relu(x @ W1 + b1) @ W2 + b2
# ----------------------------------------------------------------------------
def _ffnn_kernel(x_ref, w1_ref, b1_ref, w2_ref, b2_ref, o_ref, *, hidden_chunk):
    # x_ref : (TM, d_model)   current row tile
    # w1_ref: (d_model, dff)  resident across the grid (single-buffered)
    # b1_ref: (1, dff)
    # w2_ref: (dff, d_model)  resident across the grid (single-buffered)
    # b2_ref: (1, d_model)
    # o_ref : (TM, d_model)
    x = x_ref[...]
    dff = w1_ref.shape[1]
    d_model = o_ref.shape[-1]
    num_chunks = dff // hidden_chunk

    # f32 accumulator for the output tile; hidden activations are materialized
    # only (TM, hidden_chunk) at a time.
    acc = jnp.zeros((x.shape[0], d_model), jnp.float32)
    for c in range(num_chunks):                  # static, small trip count
        lo = c * hidden_chunk
        hi = lo + hidden_chunk
        h = jnp.dot(x, w1_ref[:, lo:hi], preferred_element_type=jnp.float32)
        h = jnp.maximum(h + b1_ref[:, lo:hi].astype(jnp.float32), 0.0)
        acc = acc + jnp.dot(h.astype(w2_ref.dtype), w2_ref[lo:hi, :],
                            preferred_element_type=jnp.float32)

    acc = acc + b2_ref[...].astype(jnp.float32)
    o_ref[...] = acc.astype(o_ref.dtype)


# ----------------------------------------------------------------------------
# Wrapper (forward pass)
# ----------------------------------------------------------------------------
def ffnn_forward(x: jnp.ndarray,
                 w1: jnp.ndarray,
                 b1: jnp.ndarray,
                 w2: jnp.ndarray,
                 b2: jnp.ndarray,
                 *,
                 block_rows: int = 512,
                 compute_dtype=None) -> jnp.ndarray:
    """FFNN forward: relu(x @ w1 + b1) @ w2 + b2.

    x : (batch, seq_len, d_model)
    w1: (d_model, dff)   -- transpose of torch.nn.Linear(d_model, dff).weight
    b1: (dff,)
    w2: (dff, d_model)   -- transpose of torch.nn.Linear(dff, d_model).weight
    b2: (d_model,)
    compute_dtype: optional dtype (e.g. jnp.bfloat16) for the matmul operands;
                   accumulation / bias / ReLU stay in f32, output keeps x.dtype.
    """
    B, S, D = x.shape
    dff = w1.shape[1]
    assert w1.shape == (D, dff) and w2.shape == (dff, D)
    assert b1.shape == (dff,) and b2.shape == (D,)

    out_dtype = x.dtype
    if compute_dtype is not None:
        x = x.astype(compute_dtype)
        w1 = w1.astype(compute_dtype)
        w2 = w2.astype(compute_dtype)

    # Flatten (B, S, D) -> (M, D): one big independent row axis to tile over.
    M = B * S
    x2 = x.reshape(M, D)
    b1_2 = b1.reshape(1, dff)
    b2_2 = b2.reshape(1, D)

    hidden_chunk = _pick_hidden_chunk(dff)

    # ---- Per-generation VMEM budget (~48 MiB on v7x, ~96 MiB on v5e/v6e). ----
    try:
        info = pltpu.get_tpu_info()
        vmem_cap = int(getattr(info, "vmem_capacity_bytes", 0)) or (64 << 20)
    except Exception:
        vmem_cap = 64 << 20
    vmem_budget = int(vmem_cap * 0.75)

    act_item = jnp.dtype(x2.dtype).itemsize
    out_item = jnp.dtype(out_dtype).itemsize
    par_item = jnp.dtype(w1.dtype).itemsize
    param_bytes = (D * dff + dff + dff * D + D) * par_item

    def est_vmem(tm: int, param_bufs: int) -> int:
        return (2 * tm * D * act_item          # x tile (double-buffered)
                + 2 * tm * D * out_item        # out tile (double-buffered)
                + param_bufs * param_bytes     # resident weights / biases
                + tm * hidden_chunk * 4        # f32 hidden chunk
                + tm * D * 4                   # f32 output accumulator
                + (2 << 20))                   # slack

    # ---- Row tile: >=2 grid steps (so both v7x TCs get work), sublane-aligned,
    #      shrunk until the footprint fits the VMEM budget. ----
    if M <= block_rows:
        TM = max(8, _round_up(pl.cdiv(M, 2), 8))
        TM = min(TM, _round_up(M, 8))
    else:
        TM = block_rows
    while TM > 8 and est_vmem(TM, 1) > vmem_budget:
        TM = max(8, _round_up(TM // 2, 8))
    # Note: if param_bytes alone ever exceeds the budget (very large d_model/dff),
    # a dff-streamed variant (extra 'arbitrary' grid axis over dff with a
    # pl.when-initialized accumulator) would be needed; not required for the
    # shapes exercised here.

    # Last row block may be ragged; Pallas masks the out-of-bounds rows
    # (rows are independent, so padded garbage rows never reach HBM).
    grid = (pl.cdiv(M, TM),)

    vmem_limit = int(min(max(est_vmem(TM, 2), 16 << 20), vmem_budget))

    cost = pl.CostEstimate(
        flops=4 * M * D * dff,
        transcendentals=0,
        bytes_accessed=int(M * D * (act_item + out_item) + param_bytes),
    )

    kernel = functools.partial(_ffnn_kernel, hidden_chunk=hidden_chunk)

    def make_call(single_buffer_params: bool):
        # Constant-index weights still get 2 pipeline buffers by default;
        # Buffered(1) halves their VMEM footprint.
        pm = {"pipeline_mode": pl.Buffered(1)} if single_buffer_params else {}
        return pl.pallas_call(
            kernel,
            out_shape=jax.ShapeDtypeStruct((M, D), out_dtype),
            grid_spec=pltpu.PrefetchScalarGridSpec(
                num_scalar_prefetch=0,
                grid=grid,
                in_specs=[
                    pl.BlockSpec((TM, D), lambda i: (i, 0)),          # x row tile
                    pl.BlockSpec((D, dff), lambda i: (0, 0), **pm),   # W1 (resident)
                    pl.BlockSpec((1, dff), lambda i: (0, 0), **pm),   # b1 (resident)
                    pl.BlockSpec((dff, D), lambda i: (0, 0), **pm),   # W2 (resident)
                    pl.BlockSpec((1, D), lambda i: (0, 0), **pm),     # b2 (resident)
                ],
                out_specs=pl.BlockSpec((TM, D), lambda i: (i, 0)),
            ),
            compiler_params=pltpu.CompilerParams(
                dimension_semantics=("parallel",),   # row tiles are independent
                vmem_limit_bytes=vmem_limit,
            ),
            cost_estimate=cost,
        )

    try:
        out = make_call(True)(x2, w1, b1_2, w2, b2_2)
    except Exception:
        # Fallback: default (double-buffered) weight specs in case Buffered(1)
        # is rejected by this jax / Mosaic version.
        out = make_call(False)(x2, w1, b1_2, w2, b2_2)

    return out.reshape(B, S, D)


if __name__ == "__main__":
    # Small shapes consistent with the module: batch=2, seq=8, d_model=32, dff=64.
    # (Note: real FFNN shapes should use 128-multiple d_model/dff for lane-dense
    # stores and full MXU utilization; these tiny dims only exercise correctness.)
    params = {"d_model": 32, "dff": 64}
    batch, seq_len = 2, 8
    D, F = params["d_model"], params["dff"]

    key = jax.random.PRNGKey(0)
    kx, k1, k2, k3, k4 = jax.random.split(key, 5)

    x = jax.random.normal(kx, (batch, seq_len, D), dtype=jnp.float32)
    # Weights stored as (in_features, out_features), i.e. the transpose of
    # torch.nn.Linear.weight, so the kernel computes x @ W directly.
    w1 = jax.random.normal(k1, (D, F), dtype=jnp.float32) * (1.0 / jnp.sqrt(D))
    b1 = jax.random.normal(k2, (F,), dtype=jnp.float32) * 0.01
    w2 = jax.random.normal(k3, (F, D), dtype=jnp.float32) * (1.0 / jnp.sqrt(F))
    b2 = jax.random.normal(k4, (D,), dtype=jnp.float32) * 0.01

    # Pure-JAX reference: W2(relu(W1(x))).
    ref = jnp.maximum(x @ w1 + b1, 0.0) @ w2 + b2

    # f32 path: tight tolerance.
    out = jax.block_until_ready(ffnn_forward(x, w1, b1, w2, b2))
    assert out.shape == (batch, seq_len, D)
    assert jnp.allclose(out, ref, atol=1e-4, rtol=1e-4), "FFNN f32 mismatch vs reference"

    # bf16 MXU path (matmuls in bf16, f32 accumulation): looser tolerance.
    out_bf16 = jax.block_until_ready(
        ffnn_forward(x, w1, b1, w2, b2, compute_dtype=jnp.bfloat16))
    assert out_bf16.shape == (batch, seq_len, D)
    assert jnp.allclose(out_bf16, ref, atol=1e-1, rtol=1e-1), "FFNN bf16 mismatch vs reference"

    print("KERNEL_OK")
</pallas_src>

<mosaic_0001>
module attributes {stable_mosaic.version = 11 : i64} {
  func.func @_ffnn_kernel(%arg0: i32, %arg1: memref<8x32xf32, #tpu.memory_space<vmem>>, %arg2: memref<32x64xf32, #tpu.memory_space<vmem>>, %arg3: memref<1x64xf32, #tpu.memory_space<vmem>>, %arg4: memref<64x32xf32, #tpu.memory_space<vmem>>, %arg5: memref<1x32xf32, #tpu.memory_space<vmem>>, %arg6: memref<8x32xf32, #tpu.memory_space<vmem>>) attributes {dimension_semantics = [#tpu.dimension_semantics<parallel>], iteration_bounds = array<i64: 2>, scalar_prefetch = 0 : i64, scratch_operands = 0 : i64, tpu.core_type = #tpu.core_type<tc>, window_params = [{transform_indices = @transform_0, window_bounds = array<i64: 8, 32>}, {pipeline_mode = #tpu.pipeline_mode<synchronous>, transform_indices = @transform_1, window_bounds = array<i64: 32, 64>}, {pipeline_mode = #tpu.pipeline_mode<synchronous>, transform_indices = @transform_2, window_bounds = array<i64: 1, 64>}, {pipeline_mode = #tpu.pipeline_mode<synchronous>, transform_indices = @transform_3, window_bounds = array<i64: 64, 32>}, {pipeline_mode = #tpu.pipeline_mode<synchronous>, transform_indices = @transform_4, window_bounds = array<i64: 1, 32>}, {transform_indices = @transform_5, window_bounds = array<i64: 8, 32>}]} {
    %c0 = arith.constant 0 : index
    %c0_0 = arith.constant 0 : index
    %0 = vector.load %arg1[%c0, %c0_0] : memref<8x32xf32, #tpu.memory_space<vmem>>, vector<8x32xf32>
    %cst = arith.constant 0.000000e+00 : f32
    %1 = vector.broadcast %cst : f32 to vector<8x32xf32>
    %c0_1 = arith.constant 0 : index
    %c0_2 = arith.constant 0 : index
    %2 = vector.load %arg2[%c0_1, %c0_2] : memref<32x64xf32, #tpu.memory_space<vmem>>, vector<32x64xf32>
    %cst_3 = arith.constant dense<0.000000e+00> : vector<8x64xf32>
    %3 = tpu.matmul %0, %2, %cst_3 {dimension_numbers = #tpu.dot_dimension_numbers<[1], [0], [0], [1], [0, 0, 1, 1], [], []>} : vector<8x32xf32>, vector<32x64xf32>, vector<8x64xf32> -> vector<8x64xf32>
    %c0_4 = arith.constant 0 : index
    %c0_5 = arith.constant 0 : index
    %4 = vector.load %arg3[%c0_4, %c0_5] : memref<1x64xf32, #tpu.memory_space<vmem>>, vector<1x64xf32>
    %5 = vector.broadcast %4 : vector<1x64xf32> to vector<8x64xf32>
    %6 = arith.addf %3, %5 : vector<8x64xf32>
    %cst_6 = arith.constant 0.000000e+00 : f32
    %7 = vector.broadcast %cst_6 : f32 to vector<8x64xf32>
    %8 = arith.maximumf %6, %7 : vector<8x64xf32>
    %c0_7 = arith.constant 0 : index
    %c0_8 = arith.constant 0 : index
    %9 = vector.load %arg4[%c0_7, %c0_8] : memref<64x32xf32, #tpu.memory_space<vmem>>, vector<64x32xf32>
    %cst_9 = arith.constant dense<0.000000e+00> : vector<8x32xf32>
    %10 = tpu.matmul %8, %9, %cst_9 {dimension_numbers = #tpu.dot_dimension_numbers<[1], [0], [0], [1], [0, 0, 1, 1], [], []>} : vector<8x64xf32>, vector<64x32xf32>, vector<8x32xf32> -> vector<8x32xf32>
    %11 = arith.addf %1, %10 : vector<8x32xf32>
    %c0_10 = arith.constant 0 : index
    %c0_11 = arith.constant 0 : index
    %12 = vector.load %arg5[%c0_10, %c0_11] : memref<1x32xf32, #tpu.memory_space<vmem>>, vector<1x32xf32>
    %13 = vector.broadcast %12 : vector<1x32xf32> to vector<8x32xf32>
    %14 = arith.addf %11, %13 : vector<8x32xf32>
    %c0_12 = arith.constant 0 : index
    %c0_13 = arith.constant 0 : index
    %15 = vector.load %arg6[%c0_12, %c0_13] : memref<8x32xf32, #tpu.memory_space<vmem>>, vector<8x32xf32>
    tpu.vector_store %arg6[%c0_12, %c0_13], %14 {strides = array<i32>} : memref<8x32xf32, #tpu.memory_space<vmem>>, vector<8x32xf32>,
    return
  }
  func.func @transform_0(%arg0: i32) -> (i32, i32) {
    %c0_i32 = arith.constant 0 : i32
    %c0_i32_0 = arith.constant 0 : i32
    return %arg0, %c0_i32 : i32, i32
  }
  func.func @transform_1(%arg0: i32) -> (i32, i32) {
    %c0_i32 = arith.constant 0 : i32
    %c0_i32_0 = arith.constant 0 : i32
    %c0_i32_1 = arith.constant 0 : i32
    return %c0_i32, %c0_i32_0 : i32, i32
  }
  func.func @transform_2(%arg0: i32) -> (i32, i32) {
    %c0_i32 = arith.constant 0 : i32
    %c0_i32_0 = arith.constant 0 : i32
    %c0_i32_1 = arith.constant 0 : i32
    return %c0_i32, %c0_i32_0 : i32, i32
  }
  func.func @transform_3(%arg0: i32) -> (i32, i32) {
    %c0_i32 = arith.constant 0 : i32
    %c0_i32_0 = arith.constant 0 : i32
    %c0_i32_1 = arith.constant 0 : i32
    return %c0_i32, %c0_i32_0 : i32, i32
  }
  func.func @transform_4(%arg0: i32) -> (i32, i32) {
    %c0_i32 = arith.constant 0 : i32
    %c0_i32_0 = arith.constant 0 : i32
    %c0_i32_1 = arith.constant 0 : i32
    return %c0_i32, %c0_i32_0 : i32, i32
  }
  func.func @transform_5(%arg0: i32) -> (i32, i32) {
    %c0_i32 = arith.constant 0 : i32
    %c0_i32_0 = arith.constant 0 : i32
    return %arg0, %c0_i32 : i32, i32
  }
}

module attributes {stable_mosaic.version = 11 : i64} {
  func.func @_ffnn_kernel(%arg0: i32, %arg1: memref<8x32xf32, #tpu.memory_space<vmem>>, %arg2: memref<32x64xf32, #tpu.memory_space<vmem>>, %arg3: memref<1x64xf32, #tpu.memory_space<vmem>>, %arg4: memref<64x32xf32, #tpu.memory_space<vmem>>, %arg5: memref<1x32xf32, #tpu.memory_space<vmem>>, %arg6: memref<8x32xf32, #tpu.memory_space<vmem>>) attributes {dimension_semantics = [#tpu.dimension_semantics<parallel>], iteration_bounds = array<i64: 2>, scalar_prefetch = 0 : i64, scratch_operands = 0 : i64, tpu.core_type = #tpu.core_type<tc>, window_params = [{transform_indices = @transform_0, window_bounds = array<i64: 8, 32>}, {pipeline_mode = #tpu.pipeline_mode<synchronous>, transform_indices = @transform_1, window_bounds = array<i64: 32, 64>}, {pipeline_mode = #tpu.pipeline_mode<synchronous>, transform_indices = @transform_2, window_bounds = array<i64: 1, 64>}, {pipeline_mode = #tpu.pipeline_mode<synchronous>, transform_indices = @transform_3, window_bounds = array<i64: 64, 32>}, {pipeline_mode = #tpu.pipeline_mode<synchronous>, transform_indices = @transform_4, window_bounds = array<i64: 1, 32>}, {transform_indices = @transform_5, window_bounds = array<i64: 8, 32>}]} {
    %c0 = arith.constant 0 : index
    %c0_0 = arith.constant 0 : index
    %0 = vector.load %arg1[%c0, %c0_0] : memref<8x32xf32, #tpu.memory_space<vmem>>, vector<8x32xf32>
    %cst = arith.constant 0.000000e+00 : f32
    %1 = vector.broadcast %cst : f32 to vector<8x32xf32>
    %c0_1 = arith.constant 0 : index
    %c0_2 = arith.constant 0 : index
    %2 = vector.load %arg2[%c0_1, %c0_2] : memref<32x64xf32, #tpu.memory_space<vmem>>, vector<32x64xf32>
    %cst_3 = arith.constant dense<0.000000e+00> : vector<8x64xf32>
    %3 = tpu.matmul %0, %2, %cst_3 {dimension_numbers = #tpu.dot_dimension_numbers<[1], [0], [0], [1], [0, 0, 1, 1], [], []>} : vector<8x32xf32>, vector<32x64xf32>, vector<8x64xf32> -> vector<8x64xf32>
    %c0_4 = arith.constant 0 : index
    %c0_5 = arith.constant 0 : index
    %4 = vector.load %arg3[%c0_4, %c0_5] : memref<1x64xf32, #tpu.memory_space<vmem>>, vector<1x64xf32>
    %5 = vector.broadcast %4 : vector<1x64xf32> to vector<8x64xf32>
    %6 = arith.addf %3, %5 : vector<8x64xf32>
    %cst_6 = arith.constant 0.000000e+00 : f32
    %7 = vector.broadcast %cst_6 : f32 to vector<8x64xf32>
    %8 = arith.maximumf %6, %7 : vector<8x64xf32>
    %c0_7 = arith.constant 0 : index
    %c0_8 = arith.constant 0 : index
    %9 = vector.load %arg4[%c0_7, %c0_8] : memref<64x32xf32, #tpu.memory_space<vmem>>, vector<64x32xf32>
    %cst_9 = arith.constant dense<0.000000e+00> : vector<8x32xf32>
    %10 = tpu.matmul %8, %9, %cst_9 {dimension_numbers = #tpu.dot_dimension_numbers<[1], [0], [0], [1], [0, 0, 1, 1], [], []>} : vector<8x64xf32>, vector<64x32xf32>, vector<8x32xf32> -> vector<8x32xf32>
    %11 = arith.addf %1, %10 : vector<8x32xf32>
    %c0_10 = arith.constant 0 : index
    %c0_11 = arith.constant 0 : index
    %12 = vector.load %arg5[%c0_10, %c0_11] : memref<1x32xf32, #tpu.memory_space<vmem>>, vector<1x32xf32>
    %13 = vector.broadcast %12 : vector<1x32xf32> to vector<8x32xf32>
    %14 = arith.addf %11, %13 : vector<8x32xf32>
    %c0_12 = arith.constant 0 : index
    %c0_13 = arith.constant 0 : index
    %15 = vector.load %arg6[%c0_12, %c0_13] : memref<8x32xf32, #tpu.memory_space<vmem>>, vector<8x32xf32>
    tpu.vector_store %arg6[%c0_12, %c0_13], %14 {strides = array<i32>} : memref<8x32xf32, #tpu.memory_space<vmem>>, vector<8x32xf32>,
    return
  }
  func.func @transform_0(%arg0: i32) -> (i32, i32) {
    %c0_i32 = arith.constant 0 : i32
    %c0_i32_0 = arith.constant 0 : i32
    return %arg0, %c0_i32 : i32, i32
  }
  func.func @transform_1(%arg0: i32) -> (i32, i32) {
    %c0_i32 = arith.constant 0 : i32
    %c0_i32_0 = arith.constant 0 : i32
    %c0_i32_1 = arith.constant 0 : i32
    return %c0_i32, %c0_i32_0 : i32, i32
  }
  func.func @transform_2(%arg0: i32) -> (i32, i32) {
    %c0_i32 = arith.constant 0 : i32
    %c0_i32_0 = arith.constant 0 : i32
    %c0_i32_1 = arith.constant 0 : i32
    return %c0_i32, %c0_i32_0 : i32, i32
  }
  func.func @transform_3(%arg0: i32) -> (i32, i32) {
    %c0_i32 = arith.constant 0 : i32
    %c0_i32_0 = arith.constant 0 : i32
    %c0_i32_1 = arith.constant 0 : i32
    return %c0_i32, %c0_i32_0 : i32, i32
  }
  func.func @transform_4(%arg0: i32) -> (i32, i32) {
    %c0_i32 = arith.constant 0 : i32
    %c0_i32_0 = arith.constant 0 : i32
    %c0_i32_1 = arith.constant 0 : i32
    return %c0_i32, %c0_i32_0 : i32, i32
  }
  func.func @transform_5(%arg0: i32) -> (i32, i32) {
    %c0_i32 = arith.constant 0 : i32
    %c0_i32_0 = arith.constant 0 : i32
    return %arg0, %c0_i32 : i32, i32
  }
}

</mosaic_0001>

<bundles_post_ra>
// kernel: tpu_custom_call.1
= control target key start
LH: loop header
LB: loop body
LE: loop exit
PB: predicated region body
PF: predicated region fallthrough
CT: control target
= control target key end

     0   :  { %10 = vsyncpa [#allocation3], 0  ;;  %s803_s0 = inlined_call_operand.vmem [shape: f32[16,32], index: 0, kind: input, shape index: {}]   ;;  %s804_s1 = inlined_call_operand.vmem [shape: f32[32,64], index: 1, kind: input, shape index: {}]   ;;  %s805_s2 = inlined_call_operand.vmem [shape: f32[1,64], index: 2, kind: input, shape index: {}]   ;;  %s806_s3 = inlined_call_operand.vmem [shape: f32[64,32], index: 3, kind: input, shape index: {}]   ;;  %s807_s4 = inlined_call_operand.vmem [shape: f32[1,32], index: 4, kind: input, shape index: {}]   ;;  %s808_s5 = inlined_call_operand.hbm [shape: f32[16,32], index: 5, kind: output, shape index: {}]  }
   0x1   :  { %12 = vsyncpa [#allocation3 + $0x1], 0  ;;  %s664_s18 = smov 0   ;;  %s666_s19 = smov 0  }
   0x2   :  { %s668_s20 = smov 0   ;;  %s670_s21 = smov 0  }
   0x3 LB: > { %s685_s22 = sadd.s32 4294967295, %s629_s21   ;;  %s470_s23 = sadd.s32 4294967294, %s629_s21   ;;  %s629_s21 = sphi %s670_s21, %s814_s21   ;;  %s625_s20 = sphi %s668_s20, %s813_s20   ;;  %s621_s19 = sphi %s666_s19, %s812_s19   ;;  %s617_s18 = sphi %s664_s18, %s811_s18  }
   0x4   : > { %s689_s24 = sadd.s32 1, %s629_s21   ;;  %s135_s25 = sadd.s32 1, %s625_s20 }
   0x5   : > { %s132_s26 = ssub.s32 %s629_s21, %s689_s24  ;;  %p145_p0 = scmp.ne.s32.totalorder %s625_s20, %s621_s19 }
   0x6   : > { %p133_p1 = scmp.eq.s32.totalorder %s132_s26, 0  ;;  %p146_p2 = scmp.eq.s32.totalorder %s685_s22, 1 }
   0x7   : > { %p151_p3 = scmp.ne.s32.totalorder %s621_s19, %s617_s18  ;;  %p152_p4 = scmp.eq.s32.totalorder %s470_s23, 1 }
   0x8   : > { %s700_s27 = scalar_select %p133_p1, %s625_s20, %s135_s25  }
   0x9   : > { %p702_p5 = por %p146_p2, %p145_p0  ;;  %p706_p6 = por %p152_p4, %p151_p3 }
   0xa   : > { %p473_p7 = scmp.ge.s32.totalorder %s629_s21, 1  ;;  %p189_p8 = scmp.lt.s32.totalorder %s629_s21, 3 }
   0xc   : > { %p190_p9 = pnand %p473_p7, %p189_p8 }
   0xd   : > { %p216_p10 = scmp.lt.s32.totalorder (!%p190_p9), %s685_s22, 1  ;;  %s213_s26 = sand.u32 (!%p190_p9), 1, %s621_s19  }
   0xe   : > { %193 = sbr.rel (%p190_p9) target bundleno = 433 (0x1b1), region = 40  ;;  %s474_s30 = sshll.u32 (!%p190_p9), %s213_s26, 3 }
   0xf   : > { %s481_s8 = sshll.u32 (!%p190_p9), %s685_s22, 7  ;;  %s215_s9 = scalar_lea.vmem (!%p190_p9), [#allocation2], %s474_s30 }
  0x10   : > { %s411_s10 = sshll.u32 (!%p190_p9), %s215_s9, 4  ;;  %s767_s13 = scalar_lea.hbm (!%p190_p9), %s808_s5, %s481_s8  ;;  %s412_s10 = int_to_ptr.vmem [resolvable:$true] %s411_s10 }
  0x11   : > { %s398_s14 = scalar_lea.sflag (!%p190_p9), [#allocation3], %s213_s26  ;;  %s569_s15 = scalar_lea.vmem (!%p190_p9), %s412_s10, 128 }
  0x12   : > { %p570_p11 = scmp.ne.s32.totalorder (!%p190_p9), %s412_s10, %s569_s15 }
  0x13   : > { %v224_v0 = vld [vmem:[%s804_s1 + $0x18] sm:$0xff]  ;;  %v631_v1 = vmov 0.0   ;;  %v223_v2 = vld [vmem:[%s804_s1 + $0x10] sm:$0xff]  ;;  %vm632_vm0 = vmmov 0   ;;  %s217_s11 = scalar_select %p216_p10, %s685_s22, 1  ;;  %v222_v5 = vld [vmem:[%s804_s1 + $0x8] sm:$0xff] }
  0x14   : > { %498 = vmatprep.subr.mxu0 %v631_v1  ;;  %506 = vmatprep.mubr.msk.f32.mxu0 %vm632_vm0, %v631_v1  ;;  %v314_v3 = vld [vmem:[%s806_s3 + $0x38] sm:$0xff]  ;;  %v313_v4 = vld [vmem:[%s806_s3 + $0x30] sm:$0xff]  ;;  %v312_v6 = vld [vmem:[%s806_s3 + $0x28] sm:$0xff]  ;;  %vm232_vm1 = vcmask 261120   ;;  %vm322_vm2 = vcmask 523264   ;;  %p571_p12 = pnand %p570_p11, %p702_p5  ;;  %s633_s22 = smov [#allocation2]  }
  0x15   : > { %499 = vmatpush3.msra.mxu0 %v224_v0  ;;  %509 = vmatprep.subr.mxu1 %v631_v1  ;;  %s475_s16 = sshll.u32 %s217_s11, 3  ;;  %v221_v7 = vld [vmem:[%s804_s1] sm:$0xff]  ;;  %v310_v10 = vld [vmem:[%s806_s3 + $0x18] sm:$0xff]  ;;  %v309_v11 = vld [vmem:[%s806_s3 + $0x10] sm:$0xff] }
  0x16   : > { %500 = vmatprep.subr.mxu0 %v631_v1  ;;  %510 = vmatpush3.msra.mxu1 %v314_v3  ;;  %s219_s7 = scalar_lea.vmem %s803_s0, %s475_s16  ;;  %v311_v9 = vld [vmem:[%s806_s3 + $0x20] sm:$0xff]  ;;  %v308_v12 = vld [vmem:[%s806_s3 + $0x8] sm:$0xff]  ;;  %p572_p13 = pneg %p571_p12 }
  0x17   : > { %501 = vmatpush3.msra.mxu0 %v223_v2  ;;  %511 = vmatprep.subr.mxu1 %v631_v1  ;;  %v220_v8 = vld [vmem:[%s219_s7] sm:$0xff]  ;;  %s573_s16 = sshll.u32 %s633_s22, 4  ;;  %s574_s16 = int_to_ptr.vmem [resolvable:$false] %s573_s16 }
  0x18   : > { %502 = vmatprep.subr.mxu0 %v631_v1  ;;  %512 = vmatpush3.msra.mxu1 %v313_v4  ;;  %v307_v13 = vld [vmem:[%s806_s3] sm:$0xff]  ;;  %s575_s17 = scalar_lea.vmem %s574_s16, 256  ;;  %p576_p0 = scmp.lt.s32.totalorder %s412_s10, %s574_s16 }
  0x19   : > { %503 = vmatpush3.msra.mxu0 %v222_v5  ;;  %513 = vmatprep.subr.mxu1 %v631_v1  ;;  %v476_v14 = vld [vmem:[%s805_s2] ss:$0 sm:$0xff]  ;;  %p577_p1 = scmp.lt.s32.totalorder %s575_s17, %s569_s15 }
  0x1a   : > { %504 = vmatprep.subr.mxu0 %v631_v1  ;;  %514 = vmatpush3.msra.mxu1 %v312_v6  ;;  %v478_v19 = vld [vmem:[%s807_s4] ss:$0 sm:$0xff] }
  0x1b   : > { %505 = vmatpush3.msra.mxu0 %v221_v7  ;;  %515 = vmatprep.subr.mxu1 %v631_v1  ;;  %p578_p2 = por %p577_p1, %p576_p0 }
  0x1c   : > { %507 = vmatmul.mubr.msk.f32.vlgmr.msra.gmra.mxu0 %vm232_vm1, %v220_v8  ;;  %516 = vmatpush3.msra.mxu1 %v311_v9 }
  0x1d   : > { %517 = vmatprep.subr.mxu1 %v631_v1  ;;  %525 = vmatprep.mubr.msk.f32.mxu1 %vm632_vm0, %v631_v1  ;;  %p579_p3 = pnand %p578_p2, %p572_p13 }
  0x1e   : > { %518 = vmatpush3.msra.mxu1 %v310_v10 }
  0x1f   : > { %519 = vmatprep.subr.mxu1 %v631_v1 }
  0x20   : > { %520 = vmatpush3.msra.mxu1 %v309_v11 }
  0x21   : > { %521 = vmatprep.subr.mxu1 %v631_v1 }
  0x22   : > { %522 = vmatpush3.msra.mxu1 %v308_v12 }
  0x23   : > { %523 = vmatprep.subr.mxu1 %v631_v1 }
  0x24   : > { %524 = vmatpush3.msra.mxu1 %v307_v13 }
  0xdc   : > { %v302_v15 = vpop.f32.mrf.mxu0 }
  0xdd   : > { %v303_v16 = vadd.f32 %v476_v14, %v302_v15 }
  0xde   : > { %v508_v17 = vpop.f32.mrf.mxu0 }
  0xdf   : > { %v306_v18 = vmax.f32 %v303_v16, 0.0 }
  0xe1   : > { %526 = vmatmul.mubr.msk.f32.vlgmr.msra.gmra.mxu1 %vm322_vm2, %v306_v18 }
 0x1a1   : > { %v392_v20 = vpop.f32.mrf.mxu1 }
 0x1a2   : > { %v393_v21 = vadd.f32 %v478_v19, %v392_v20 }
 0x1a3   : > { %v527_v22 = vpop.f32.mrf.mxu1 }
 0x1a4   : > { %396 = vst.msk [vmem:[%s215_s9] sm:$0xff] %vm232_vm1, %v393_v21 }
 0x1a5   : > { %582 = shalt.err (!%p579_p3)
}
 0x1a6   : > { %s583_s23 = scalar_lea.hbm %s767_s13, 128  ;;  %s587_s30 = scalar_lea.hbm %s808_s5, 256 }
 0x1a7   : > { %p584_p4 = scmp.ne.s32.totalorder %s767_s13, %s583_s23  ;;  %p588_p9 = scmp.lt.s32.totalorder %s767_s13, %s808_s5 }
 0x1a8   : > { %p589_p10 = scmp.lt.s32.totalorder %s587_s30, %s583_s23 }
 0x1a9   : > { %p585_p7 = pnand %p584_p4, %p702_p5 }
 0x1aa   : > { %p590_p11 = por %p589_p10, %p588_p9 }
 0x1ab   : > { %p586_p8 = pneg %p585_p7 }
 0x1ad   : > { %p591_p12 = pnand %p590_p11, %p586_p8 }
 0x1af   : > { %594 = shalt.err (!%p591_p12)
}
 0x1b0   : > { %528 = dma.vmem_to_hbm [thread:$0]  (%p702_p5), %s412_s10, 128, %s767_s13, %s398_s14  }
 0x1b1 PF: > { %p534_p13 = scmp.ge.s32.totalorder %s629_s21, 2  ;;  %s423_s8 = sand.u32 1, %s617_s18  }
 0x1b2   : > { %s424_s9 = scalar_lea.sflag [#allocation3], %s423_s8 }
 0x1b3   : > { %p531_p0 = pnand %p534_p13, %p706_p6 }
 0x1b5   : > { %p532_p1 = pneg %p531_p0 }
 0x1b7   : > { %612 = dma.done.wait (%p532_p1), %s424_s9, 128  }
 0x1b8   : > { %614 = vsyncadd (%p532_p1), %s424_s9, 4294967168  ;;  %p15_p2 = scmp.ge.s32.totalorder %s689_s24, 4   ;;  %s811_s18 = smov %s621_s19 }
 0x1b9   : > { %s812_s19 = smov %s625_s20  ;;  %s813_s20 = smov %s700_s27 }
 0x1ba   : > { %s814_s21 = smov %s689_s24  ;;  %17 = sbr.rel (!%p15_p2) target bundleno = 3 (0x3), region = 75 }
 0x1bf   :  { %429 = vsyncpa [#allocation3], 1 }
 0x1c0   :  { %431 = vsyncpa [#allocation3 + $0x1], 1 }

// kernel: tpu_custom_call.1
= control target key start
LH: loop header
LB: loop body
LE: loop exit
PB: predicated region body
PF: predicated region fallthrough
CT: control target
= control target key end

     0   :  { %10 = vsyncpa [#allocation3], 0  ;;  %s803_s0 = inlined_call_operand.vmem [shape: f32[16,32], index: 0, kind: input, shape index: {}]   ;;  %s804_s1 = inlined_call_operand.vmem [shape: f32[32,64], index: 1, kind: input, shape index: {}]   ;;  %s805_s2 = inlined_call_operand.vmem [shape: f32[1,64], index: 2, kind: input, shape index: {}]   ;;  %s806_s3 = inlined_call_operand.vmem [shape: f32[64,32], index: 3, kind: input, shape index: {}]   ;;  %s807_s4 = inlined_call_operand.vmem [shape: f32[1,32], index: 4, kind: input, shape index: {}]   ;;  %s808_s5 = inlined_call_operand.hbm [shape: f32[16,32], index: 5, kind: output, shape index: {}]  }
   0x1   :  { %12 = vsyncpa [#allocation3 + $0x1], 0  ;;  %s664_s18 = smov 0   ;;  %s666_s19 = smov 0  }
   0x2   :  { %s668_s20 = smov 0   ;;  %s670_s21 = smov 0  }
   0x3 LB: > { %s685_s22 = sadd.s32 4294967295, %s629_s21   ;;  %s470_s23 = sadd.s32 4294967294, %s629_s21   ;;  %s629_s21 = sphi %s670_s21, %s814_s21   ;;  %s625_s20 = sphi %s668_s20, %s813_s20   ;;  %s621_s19 = sphi %s666_s19, %s812_s19   ;;  %s617_s18 = sphi %s664_s18, %s811_s18  }
   0x4   : > { %s689_s24 = sadd.s32 1, %s629_s21   ;;  %s135_s25 = sadd.s32 1, %s625_s20 }
   0x5   : > { %s132_s26 = ssub.s32 %s629_s21, %s689_s24  ;;  %p145_p0 = scmp.ne.s32.totalorder %s625_s20, %s621_s19 }
   0x6   : > { %p133_p1 = scmp.eq.s32.totalorder %s132_s26, 0  ;;  %p146_p2 = scmp.eq.s32.totalorder %s685_s22, 1 }
   0x7   : > { %p151_p3 = scmp.ne.s32.totalorder %s621_s19, %s617_s18  ;;  %p152_p4 = scmp.eq.s32.totalorder %s470_s23, 1 }
   0x8   : > { %s700_s27 = scalar_select %p133_p1, %s625_s20, %s135_s25  }
   0x9   : > { %p702_p5 = por %p146_p2, %p145_p0  ;;  %p706_p6 = por %p152_p4, %p151_p3 }
   0xa   : > { %p473_p7 = scmp.ge.s32.totalorder %s629_s21, 1  ;;  %p189_p8 = scmp.lt.s32.totalorder %s629_s21, 3 }
   0xc   : > { %p190_p9 = pnand %p473_p7, %p189_p8 }
   0xd   : > { %p216_p10 = scmp.lt.s32.totalorder (!%p190_p9), %s685_s22, 1  ;;  %s213_s26 = sand.u32 (!%p190_p9), 1, %s621_s19  }
   0xe   : > { %193 = sbr.rel (%p190_p9) target bundleno = 433 (0x1b1), region = 40  ;;  %s474_s30 = sshll.u32 (!%p190_p9), %s213_s26, 3 }
   0xf   : > { %s481_s8 = sshll.u32 (!%p190_p9), %s685_s22, 7  ;;  %s215_s9 = scalar_lea.vmem (!%p190_p9), [#allocation2], %s474_s30 }
  0x10   : > { %s411_s10 = sshll.u32 (!%p190_p9), %s215_s9, 4  ;;  %s767_s13 = scalar_lea.hbm (!%p190_p9), %s808_s5, %s481_s8  ;;  %s412_s10 = int_to_ptr.vmem [resolvable:$true] %s411_s10 }
  0x11   : > { %s398_s14 = scalar_lea.sflag (!%p190_p9), [#allocation3], %s213_s26  ;;  %s569_s15 = scalar_lea.vmem (!%p190_p9), %s412_s10, 128 }
  0x12   : > { %p570_p11 = scmp.ne.s32.totalorder (!%p190_p9), %s412_s10, %s569_s15 }
  0x13   : > { %v224_v0 = vld [vmem:[%s804_s1 + $0x18] sm:$0xff]  ;;  %v631_v1 = vmov 0.0   ;;  %v223_v2 = vld [vmem:[%s804_s1 + $0x10] sm:$0xff]  ;;  %vm632_vm0 = vmmov 0   ;;  %s217_s11 = scalar_select %p216_p10, %s685_s22, 1  ;;  %v222_v5 = vld [vmem:[%s804_s1 + $0x8] sm:$0xff] }
  0x14   : > { %498 = vmatprep.subr.mxu0 %v631_v1  ;;  %506 = vmatprep.mubr.msk.f32.mxu0 %vm632_vm0, %v631_v1  ;;  %v314_v3 = vld [vmem:[%s806_s3 + $0x38] sm:$0xff]  ;;  %v313_v4 = vld [vmem:[%s806_s3 + $0x30] sm:$0xff]  ;;  %v312_v6 = vld [vmem:[%s806_s3 + $0x28] sm:$0xff]  ;;  %vm232_vm1 = vcmask 261120   ;;  %vm322_vm2 = vcmask 523264   ;;  %p571_p12 = pnand %p570_p11, %p702_p5  ;;  %s633_s22 = smov [#allocation2]  }
  0x15   : > { %499 = vmatpush3.msra.mxu0 %v224_v0  ;;  %509 = vmatprep.subr.mxu1 %v631_v1  ;;  %s475_s16 = sshll.u32 %s217_s11, 3  ;;  %v221_v7 = vld [vmem:[%s804_s1] sm:$0xff]  ;;  %v310_v10 = vld [vmem:[%s806_s3 + $0x18] sm:$0xff]  ;;  %v309_v11 = vld [vmem:[%s806_s3 + $0x10] sm:$0xff] }
  0x16   : > { %500 = vmatprep.subr.mxu0 %v631_v1  ;;  %510 = vmatpush3.msra.mxu1 %v314_v3  ;;  %s219_s7 = scalar_lea.vmem %s803_s0, %s475_s16  ;;  %v311_v9 = vld [vmem:[%s806_s3 + $0x20] sm:$0xff]  ;;  %v308_v12 = vld [vmem:[%s806_s3 + $0x8] sm:$0xff]  ;;  %p572_p13 = pneg %p571_p12 }
  0x17   : > { %501 = vmatpush3.msra.mxu0 %v223_v2  ;;  %511 = vmatprep.subr.mxu1 %v631_v1  ;;  %v220_v8 = vld [vmem:[%s219_s7] sm:$0xff]  ;;  %s573_s16 = sshll.u32 %s633_s22, 4  ;;  %s574_s16 = int_to_ptr.vmem [resolvable:$false] %s573_s16 }
  0x18   : > { %502 = vmatprep.subr.mxu0 %v631_v1  ;;  %512 = vmatpush3.msra.mxu1 %v313_v4  ;;  %v307_v13 = vld [vmem:[%s806_s3] sm:$0xff]  ;;  %s575_s17 = scalar_lea.vmem %s574_s16, 256  ;;  %p576_p0 = scmp.lt.s32.totalorder %s412_s10, %s574_s16 }
  0x19   : > { %503 = vmatpush3.msra.mxu0 %v222_v5  ;;  %513 = vmatprep.subr.mxu1 %v631_v1  ;;  %v476_v14 = vld [vmem:[%s805_s2] ss:$0 sm:$0xff]  ;;  %p577_p1 = scmp.lt.s32.totalorder %s575_s17, %s569_s15 }
  0x1a   : > { %504 = vmatprep.subr.mxu0 %v631_v1  ;;  %514 = vmatpush3.msra.mxu1 %v312_v6  ;;  %v478_v19 = vld [vmem:[%s807_s4] ss:$0 sm:$0xff] }
  0x1b   : > { %505 = vmatpush3.msra.mxu0 %v221_v7  ;;  %515 = vmatprep.subr.mxu1 %v631_v1  ;;  %p578_p2 = por %p577_p1, %p576_p0 }
  0x1c   : > { %507 = vmatmul.mubr.msk.f32.vlgmr.msra.gmra.mxu0 %vm232_vm1, %v220_v8  ;;  %516 = vmatpush3.msra.mxu1 %v311_v9 }
  0x1d   : > { %517 = vmatprep.subr.mxu1 %v631_v1  ;;  %525 = vmatprep.mubr.msk.f32.mxu1 %vm632_vm0, %v631_v1  ;;  %p579_p3 = pnand %p578_p2, %p572_p13 }
  0x1e   : > { %518 = vmatpush3.msra.mxu1 %v310_v10 }
  0x1f   : > { %519 = vmatprep.subr.mxu1 %v631_v1 }
  0x20   : > { %520 = vmatpush3.msra.mxu1 %v309_v11 }
  0x21   : > { %521 = vmatprep.subr.mxu1 %v631_v1 }
  0x22   : > { %522 = vmatpush3.msra.mxu1 %v308_v12 }
  0x23   : > { %523 = vmatprep.subr.mxu1 %v631_v1 }
  0x24   : > { %524 = vmatpush3.msra.mxu1 %v307_v13 }
  0xdc   : > { %v302_v15 = vpop.f32.mrf.mxu0 }
  0xdd   : > { %v303_v16 = vadd.f32 %v476_v14, %v302_v15 }
  0xde   : > { %v508_v17 = vpop.f32.mrf.mxu0 }
  0xdf   : > { %v306_v18 = vmax.f32 %v303_v16, 0.0 }
  0xe1   : > { %526 = vmatmul.mubr.msk.f32.vlgmr.msra.gmra.mxu1 %vm322_vm2, %v306_v18 }
 0x1a1   : > { %v392_v20 = vpop.f32.mrf.mxu1 }
 0x1a2   : > { %v393_v21 = vadd.f32 %v478_v19, %v392_v20 }
 0x1a3   : > { %v527_v22 = vpop.f32.mrf.mxu1 }
 0x1a4   : > { %396 = vst.msk [vmem:[%s215_s9] sm:$0xff] %vm232_vm1, %v393_v21 }
 0x1a5   : > { %582 = shalt.err (!%p579_p3)
}
 0x1a6   : > { %s583_s23 = scalar_lea.hbm %s767_s13, 128  ;;  %s587_s30 = scalar_lea.hbm %s808_s5, 256 }
 0x1a7   : > { %p584_p4 = scmp.ne.s32.totalorder %s767_s13, %s583_s23  ;;  %p588_p9 = scmp.lt.s32.totalorder %s767_s13, %s808_s5 }
 0x1a8   : > { %p589_p10 = scmp.lt.s32.totalorder %s587_s30, %s583_s23 }
 0x1a9   : > { %p585_p7 = pnand %p584_p4, %p702_p5 }
 0x1aa   : > { %p590_p11 = por %p589_p10, %p588_p9 }
 0x1ab   : > { %p586_p8 = pneg %p585_p7 }
 0x1ad   : > { %p591_p12 = pnand %p590_p11, %p586_p8 }
 0x1af   : > { %594 = shalt.err (!%p591_p12)
}
 0x1b0   : > { %528 = dma.vmem_to_hbm [thread:$0]  (%p702_p5), %s412_s10, 128, %s767_s13, %s398_s14  }
 0x1b1 PF: > { %p534_p13 = scmp.ge.s32.totalorder %s629_s21, 2  ;;  %s423_s8 = sand.u32 1, %s617_s18  }
 0x1b2   : > { %s424_s9 = scalar_lea.sflag [#allocation3], %s423_s8 }
 0x1b3   : > { %p531_p0 = pnand %p534_p13, %p706_p6 }
 0x1b5   : > { %p532_p1 = pneg %p531_p0 }
 0x1b7   : > { %612 = dma.done.wait (%p532_p1), %s424_s9, 128  }
 0x1b8   : > { %614 = vsyncadd (%p532_p1), %s424_s9, 4294967168  ;;  %p15_p2 = scmp.ge.s32.totalorder %s689_s24, 4   ;;  %s811_s18 = smov %s621_s19 }
 0x1b9   : > { %s812_s19 = smov %s625_s20  ;;  %s813_s20 = smov %s700_s27 }
 0x1ba   : > { %s814_s21 = smov %s689_s24  ;;  %17 = sbr.rel (!%p15_p2) target bundleno = 3 (0x3), region = 75 }
 0x1bf   :  { %429 = vsyncpa [#allocation3], 1 }
 0x1c0   :  { %431 = vsyncpa [#allocation3 + $0x1], 1 }

</bundles_post_ra>
